<compile_context>
chip_gen: v5e
topology: v5e:2x2
jax: 0.10.0
libtpu: 0.0.40
codegen_flags: <defaults>
</compile_context>

<pallas_src>
import functools

import jax
import jax.numpy as jnp
from jax import lax
from jax.experimental import pallas as pl
from jax.experimental.pallas import tpu as pltpu


def _channel_attention_kernel(x_ref, w1t_ref, b1_ref, w2t_ref, b2_ref, o_ref,
                              sum_acc, max_acc, *,
                              hw_true, hw_tile, n_hw, needs_mask):
    hk = pl.program_id(1)
    last = n_hw - 1                                   # static python int

    @pl.when(hk == 0)
    def _init():
        sum_acc[...] = jnp.zeros_like(sum_acc)
        max_acc[...] = jnp.full_like(max_acc, -jnp.inf)

    x = x_ref[...].astype(jnp.float32)                # (block_b, C, hw_tile)

    if needs_mask:
        # Hot path: all fully in-bounds HW tiles, no masking work at all.
        @pl.when(hk < last)
        def _hot():
            sum_acc[...] += jnp.sum(x, axis=-1)
            max_acc[...] = jnp.maximum(max_acc[...], jnp.max(x, axis=-1))

        # Only the single ragged last tile pays the mask (lane-only iota).
        @pl.when(hk == last)
        def _ragged():
            rem = hw_true - last * hw_tile            # static, 0 < rem < hw_tile
            lane = lax.broadcasted_iota(jnp.int32, (1, 1, hw_tile), 2)
            valid = lane < rem                        # broadcasts over (B, C, hw)
            sum_acc[...] += jnp.sum(jnp.where(valid, x, 0.0), axis=-1)
            max_acc[...] = jnp.maximum(
                max_acc[...], jnp.max(jnp.where(valid, x, -jnp.inf), axis=-1))
    else:
        sum_acc[...] += jnp.sum(x, axis=-1)
        max_acc[...] = jnp.maximum(max_acc[...], jnp.max(x, axis=-1))

    @pl.when(hk == last)
    def _finalize():
        w1t = w1t_ref[...].astype(jnp.float32)        # (C, I)
        b1 = b1_ref[...].astype(jnp.float32)          # (1, I)
        w2t = w2t_ref[...].astype(jnp.float32)        # (I, C)
        b2 = b2_ref[...].astype(jnp.float32)          # (1, C)

        def mlp(p):                                   # (block_b, C) -> (block_b, C)
            h = jnp.dot(p, w1t, preferred_element_type=jnp.float32) + b1
            h = jnp.maximum(h, 0.0)                   # ReLU
            o = jnp.dot(h, w2t, preferred_element_type=jnp.float32) + b2
            return jax.nn.sigmoid(o)

        avg = sum_acc[...] * (1.0 / hw_true)
        out = mlp(avg) + mlp(max_acc[...])            # (block_b, C)
        o_ref[0] = out.astype(o_ref.dtype)


def _vmem_budget_bytes():
    """Scoped-VMEM budget: physical minus ~16 MiB headroom, capped at 112 MiB."""
    phys = 64 * 1024 * 1024
    try:
        info = pltpu.get_tpu_info()
        phys = int(getattr(info, "vmem_capacity_bytes", phys))
    except Exception:
        pass
    return max(32 * 1024 * 1024, min(phys - 16 * 1024 * 1024, 112 * 1024 * 1024))


def _pick_hw_tile(hw, budget_elems):
    """Largest multiple-of-128 tile <= budget, preferring exact divisors of HW."""
    if hw <= budget_elems:
        return hw
    t = max(128, (budget_elems // 128) * 128)
    lo = max(128, ((t // 2) // 128) * 128)
    for cand in range(t, lo - 1, -128):
        if hw % cand == 0:
            return cand                               # needs_mask becomes False
    return t


def channel_attention(x, w1, b1, w2, b2, *, max_block_bytes=None):
    """x: (N, C, H, W) (PyTorch NCHW).  w1: (I, C), b1: (I,), w2: (C, I), b2: (C,).
    Returns (N, C, 1, 1), matching the PyTorch module."""
    N, C, H, W = x.shape
    I = w1.shape[0]
    HW = H * W
    itemsize = jnp.dtype(x.dtype).itemsize

    x_flat = x.reshape(N, C, HW)
    w1t = w1.T                       # (C, I)
    w2t = w2.T                       # (I, C)
    b1_row = b1.reshape(1, I)
    b2_row = b2.reshape(1, C)

    vmem_limit = _vmem_budget_bytes()
    if max_block_bytes is None:
        w_itemsize = jnp.dtype(w1.dtype).itemsize
        weight_bytes = (2 * C * I + C + I) * w_itemsize
        max_block_bytes = max(
            1 << 20, min(32 << 20, (vmem_limit - weight_bytes - (4 << 20)) // 3))

    # Keep >= 2 batch-parallel grid steps whenever N >= 2 (v7x has 2 TCs and the
    # HW/reduction axis cannot be split across cores).
    cap = N if N < 2 else -(-N // 2)
    row_bytes = C * HW * itemsize

    if row_bytes <= max_block_bytes:
        block_b = max(1, min(cap, max_block_bytes // row_bytes))
        if block_b > 8:
            block_b = (block_b // 8) * 8              # sublane-friendly when large
        hw_tile = HW
    else:
        # A single batch row exceeds the block budget: tile the HW axis.
        block_b = 1
        hw_budget = max(128, max_block_bytes // (C * itemsize))
        hw_tile = _pick_hw_tile(HW, hw_budget)

    nb = pl.cdiv(N, block_b)
    nhw = pl.cdiv(HW, hw_tile)
    needs_mask = (nhw * hw_tile) != HW

    kernel = functools.partial(
        _channel_attention_kernel,
        hw_true=HW, hw_tile=hw_tile, n_hw=nhw, needs_mask=needs_mask)

    out = pl.pallas_call(
        kernel,
        out_shape=jax.ShapeDtypeStruct((nb, block_b, C), x.dtype),
        grid_spec=pltpu.PrefetchScalarGridSpec(
            num_scalar_prefetch=0,
            grid=(nb, nhw),
            in_specs=[
                pl.BlockSpec((block_b, C, hw_tile), lambda n, k: (n, 0, k)),  # x
                pl.BlockSpec((C, I), lambda n, k: (0, 0)),                    # w1^T
                pl.BlockSpec((1, I), lambda n, k: (0, 0)),                    # b1
                pl.BlockSpec((I, C), lambda n, k: (0, 0)),                    # w2^T
                pl.BlockSpec((1, C), lambda n, k: (0, 0)),                    # b2
            ],
            out_specs=pl.BlockSpec((1, block_b, C), lambda n, k: (n, 0, 0)),
            scratch_shapes=[
                pltpu.VMEM((block_b, C), jnp.float32),   # running sum
                pltpu.VMEM((block_b, C), jnp.float32),   # running max
            ],
        ),
        compiler_params=pltpu.CompilerParams(
            dimension_semantics=("parallel", "arbitrary"),
            vmem_limit_bytes=int(vmem_limit),
        ),
    )(x_flat, w1t, b1_row, w2t, b2_row)

    out = out.reshape(nb * block_b, C)[:N]            # drop padded batch rows
    return out.reshape(N, C, 1, 1)


def _reference(x, w1, b1, w2, b2):
    avg = jnp.mean(x, axis=(2, 3))                    # (N, C)
    mx = jnp.max(x, axis=(2, 3))                      # (N, C)

    def path(p):
        h = jax.nn.relu(p @ w1.T + b1)                # (N, I)
        return jax.nn.sigmoid(h @ w2.T + b2)          # (N, C)

    out = path(avg) + path(mx)
    return out.reshape(x.shape[0], x.shape[1], 1, 1)


if __name__ == "__main__":
    N, C, H, W = 2, 4, 16, 16
    I = 8  # internal_neurons

    key = jax.random.PRNGKey(0)
    kx, kw1, kb1, kw2, kb2 = jax.random.split(key, 5)

    x = jax.random.normal(kx, (N, C, H, W), dtype=jnp.float32)
    # Deterministic synthetic parameters (shapes match nn.Conv2d 1x1 weights).
    w1 = jax.random.normal(kw1, (I, C), dtype=jnp.float32) * 0.1
    b1 = jax.random.normal(kb1, (I,), dtype=jnp.float32) * 0.1
    w2 = jax.random.normal(kw2, (C, I), dtype=jnp.float32) * 0.1
    b2 = jax.random.normal(kb2, (C,), dtype=jnp.float32) * 0.1

    out = channel_attention(x, w1, b1, w2, b2)
    out = jax.block_until_ready(out)

    ref = _reference(x, w1, b1, w2, b2)
    assert out.shape == (N, C, 1, 1)
    assert jnp.allclose(out, ref, atol=1e-5, rtol=1e-5)

    print("KERNEL_OK")
</pallas_src>

<mosaic_0001>
module attributes {stable_mosaic.version = 11 : i64} {
  func.func @_channel_attention_kernel(%arg0: i32, %arg1: i32, %arg2: memref<1x4x256xf32, #tpu.memory_space<vmem>>, %arg3: memref<4x8xf32, #tpu.memory_space<vmem>>, %arg4: memref<1x8xf32, #tpu.memory_space<vmem>>, %arg5: memref<8x4xf32, #tpu.memory_space<vmem>>, %arg6: memref<1x4xf32, #tpu.memory_space<vmem>>, %arg7: memref<1x1x4xf32, #tpu.memory_space<vmem>>, %arg8: memref<1x4xf32, #tpu.memory_space<vmem>>, %arg9: memref<1x4xf32, #tpu.memory_space<vmem>>) attributes {dimension_semantics = [#tpu.dimension_semantics<parallel>, #tpu.dimension_semantics<arbitrary>], iteration_bounds = array<i64: 2, 1>, scalar_prefetch = 0 : i64, scratch_operands = 2 : i64, tpu.core_type = #tpu.core_type<tc>, window_params = [{transform_indices = @transform_0, window_bounds = array<i64: 1, 4, 256>}, {pipeline_mode = #tpu.pipeline_mode<synchronous>, transform_indices = @transform_1, window_bounds = array<i64: 4, 8>}, {pipeline_mode = #tpu.pipeline_mode<synchronous>, transform_indices = @transform_2, window_bounds = array<i64: 1, 8>}, {pipeline_mode = #tpu.pipeline_mode<synchronous>, transform_indices = @transform_3, window_bounds = array<i64: 8, 4>}, {pipeline_mode = #tpu.pipeline_mode<synchronous>, transform_indices = @transform_4, window_bounds = array<i64: 1, 4>}, {transform_indices = @transform_5, window_bounds = array<i64: 1, 1, 4>}]} {
    %c0_i32 = arith.constant 0 : i32
    %0 = arith.cmpi eq, %arg1, %c0_i32 : i32
    %1 = arith.extui %0 : i1 to i32
    %c0_i32_0 = arith.constant 0 : i32
    %2 = arith.cmpi ne, %1, %c0_i32_0 : i32
    scf.if %2 {
      %cst_14 = arith.constant 0.000000e+00 : f32
      %15 = vector.broadcast %cst_14 : f32 to vector<1x4xf32>
      %c0_15 = arith.constant 0 : index
      %c0_16 = arith.constant 0 : index
      %16 = vector.load %arg8[%c0_15, %c0_16] : memref<1x4xf32, #tpu.memory_space<vmem>>, vector<1x4xf32>
      tpu.vector_store %arg8[%c0_15, %c0_16], %15 {strides = array<i32>} : memref<1x4xf32, #tpu.memory_space<vmem>>, vector<1x4xf32>,
      %cst_17 = arith.constant 0xFF800000 : f32
      %17 = vector.broadcast %cst_17 : f32 to vector<1x4xf32>
      %c0_18 = arith.constant 0 : index
      %c0_19 = arith.constant 0 : index
      %18 = vector.load %arg9[%c0_18, %c0_19] : memref<1x4xf32, #tpu.memory_space<vmem>>, vector<1x4xf32>
      tpu.vector_store %arg9[%c0_18, %c0_19], %17 {strides = array<i32>} : memref<1x4xf32, #tpu.memory_space<vmem>>, vector<1x4xf32>,
    } else {
    }
    %c0 = arith.constant 0 : index
    %c0_1 = arith.constant 0 : index
    %c0_2 = arith.constant 0 : index
    %3 = vector.load %arg2[%c0, %c0_1, %c0_2] : memref<1x4x256xf32, #tpu.memory_space<vmem>>, vector<1x4x256xf32>
    %c0_3 = arith.constant 0 : index
    %c0_4 = arith.constant 0 : index
    %4 = vector.load %arg8[%c0_3, %c0_4] : memref<1x4xf32, #tpu.memory_space<vmem>>, vector<1x4xf32>
    %cst = arith.constant dense<0.000000e+00> : vector<1x4xf32>
    %5 = vector.multi_reduction <add>, %3, %cst [2] : vector<1x4x256xf32> to vector<1x4xf32>
    %6 = arith.addf %4, %5 : vector<1x4xf32>
    %c0_5 = arith.constant 0 : index
    %c0_6 = arith.constant 0 : index
    %7 = vector.load %arg8[%c0_5, %c0_6] : memref<1x4xf32, #tpu.memory_space<vmem>>, vector<1x4xf32>
    tpu.vector_store %arg8[%c0_5, %c0_6], %6 {strides = array<i32>} : memref<1x4xf32, #tpu.memory_space<vmem>>, vector<1x4xf32>,
    %c0_7 = arith.constant 0 : index
    %c0_8 = arith.constant 0 : index
    %8 = vector.load %arg9[%c0_7, %c0_8] : memref<1x4xf32, #tpu.memory_space<vmem>>, vector<1x4xf32>
    %cst_9 = arith.constant dense<0xFF800000> : vector<1x4xf32>
    %9 = vector.multi_reduction <maximumf>, %3, %cst_9 [2] : vector<1x4x256xf32> to vector<1x4xf32>
    %10 = arith.maximumf %8, %9 : vector<1x4xf32>
    %c0_10 = arith.constant 0 : index
    %c0_11 = arith.constant 0 : index
    %11 = vector.load %arg9[%c0_10, %c0_11] : memref<1x4xf32, #tpu.memory_space<vmem>>, vector<1x4xf32>
    tpu.vector_store %arg9[%c0_10, %c0_11], %10 {strides = array<i32>} : memref<1x4xf32, #tpu.memory_space<vmem>>, vector<1x4xf32>,
    %c0_i32_12 = arith.constant 0 : i32
    %12 = arith.cmpi eq, %arg1, %c0_i32_12 : i32
    %13 = arith.extui %12 : i1 to i32
    %c0_i32_13 = arith.constant 0 : i32
    %14 = arith.cmpi ne, %13, %c0_i32_13 : i32
    scf.if %14 {
      %c0_14 = arith.constant 0 : index
      %c0_15 = arith.constant 0 : index
      %15 = vector.load %arg3[%c0_14, %c0_15] : memref<4x8xf32, #tpu.memory_space<vmem>>, vector<4x8xf32>
      %c0_16 = arith.constant 0 : index
      %c0_17 = arith.constant 0 : index
      %16 = vector.load %arg4[%c0_16, %c0_17] : memref<1x8xf32, #tpu.memory_space<vmem>>, vector<1x8xf32>
      %c0_18 = arith.constant 0 : index
      %c0_19 = arith.constant 0 : index
      %17 = vector.load %arg5[%c0_18, %c0_19] : memref<8x4xf32, #tpu.memory_space<vmem>>, vector<8x4xf32>
      %c0_20 = arith.constant 0 : index
      %c0_21 = arith.constant 0 : index
      %18 = vector.load %arg6[%c0_20, %c0_21] : memref<1x4xf32, #tpu.memory_space<vmem>>, vector<1x4xf32>
      %c0_22 = arith.constant 0 : index
      %c0_23 = arith.constant 0 : index
      %19 = vector.load %arg8[%c0_22, %c0_23] : memref<1x4xf32, #tpu.memory_space<vmem>>, vector<1x4xf32>
      %cst_24 = arith.constant 3.906250e-03 : f32
      %20 = vector.broadcast %cst_24 : f32 to vector<1x4xf32>
      %21 = arith.mulf %19, %20 : vector<1x4xf32>
      %cst_25 = arith.constant dense<0.000000e+00> : vector<1x8xf32>
      %22 = tpu.matmul %21, %15, %cst_25 {dimension_numbers = #tpu.dot_dimension_numbers<[1], [0], [0], [1], [0, 0, 1, 1], [], []>} : vector<1x4xf32>, vector<4x8xf32>, vector<1x8xf32> -> vector<1x8xf32>
      %23 = arith.addf %22, %16 : vector<1x8xf32>
      %cst_26 = arith.constant 0.000000e+00 : f32
      %24 = vector.broadcast %cst_26 : f32 to vector<1x8xf32>
      %25 = arith.maximumf %23, %24 : vector<1x8xf32>
      %cst_27 = arith.constant dense<0.000000e+00> : vector<1x4xf32>
      %26 = tpu.matmul %25, %17, %cst_27 {dimension_numbers = #tpu.dot_dimension_numbers<[1], [0], [0], [1], [0, 0, 1, 1], [], []>} : vector<1x8xf32>, vector<8x4xf32>, vector<1x4xf32> -> vector<1x4xf32>
      %27 = arith.addf %26, %18 : vector<1x4xf32>
      %28 = arith.negf %27 : vector<1x4xf32>
      %29 = math.exp %28 : vector<1x4xf32>
      %cst_28 = arith.constant 1.000000e+00 : f32
      %30 = vector.broadcast %cst_28 : f32 to vector<1x4xf32>
      %31 = arith.addf %30, %29 : vector<1x4xf32>
      %32 = arith.divf %30, %31 : vector<1x4xf32>
      %c0_29 = arith.constant 0 : index
      %c0_30 = arith.constant 0 : index
      %33 = vector.load %arg9[%c0_29, %c0_30] : memref<1x4xf32, #tpu.memory_space<vmem>>, vector<1x4xf32>
      %cst_31 = arith.constant dense<0.000000e+00> : vector<1x8xf32>
      %34 = tpu.matmul %33, %15, %cst_31 {dimension_numbers = #tpu.dot_dimension_numbers<[1], [0], [0], [1], [0, 0, 1, 1], [], []>} : vector<1x4xf32>, vector<4x8xf32>, vector<1x8xf32> -> vector<1x8xf32>
      %35 = arith.addf %34, %16 : vector<1x8xf32>
      %cst_32 = arith.constant 0.000000e+00 : f32
      %36 = vector.broadcast %cst_32 : f32 to vector<1x8xf32>
      %37 = arith.maximumf %35, %36 : vector<1x8xf32>
      %cst_33 = arith.constant dense<0.000000e+00> : vector<1x4xf32>
      %38 = tpu.matmul %37, %17, %cst_33 {dimension_numbers = #tpu.dot_dimension_numbers<[1], [0], [0], [1], [0, 0, 1, 1], [], []>} : vector<1x8xf32>, vector<8x4xf32>, vector<1x4xf32> -> vector<1x4xf32>
      %39 = arith.addf %38, %18 : vector<1x4xf32>
      %40 = arith.negf %39 : vector<1x4xf32>
      %41 = math.exp %40 : vector<1x4xf32>
      %cst_34 = arith.constant 1.000000e+00 : f32
      %42 = vector.broadcast %cst_34 : f32 to vector<1x4xf32>
      %43 = arith.addf %42, %41 : vector<1x4xf32>
      %44 = arith.divf %42, %43 : vector<1x4xf32>
      %45 = arith.addf %32, %44 : vector<1x4xf32>
      %c0_35 = arith.constant 0 : index
      %c0_36 = arith.constant 0 : index
      %c0_37 = arith.constant 0 : index
      %46 = vector.load %arg7[%c0_35, %c0_36, %c0_37] : memref<1x1x4xf32, #tpu.memory_space<vmem>>, vector<1x1x4xf32>
      %47 = vector.shape_cast %46 : vector<1x1x4xf32> to vector<1x4xf32>
      %48 = vector.shape_cast %45 : vector<1x4xf32> to vector<1x1x4xf32>
      tpu.vector_store %arg7[%c0_35, %c0_36, %c0_37], %48 {strides = array<i32>} : memref<1x1x4xf32, #tpu.memory_space<vmem>>, vector<1x1x4xf32>,
    } else {
    }
    return
  }
  func.func @transform_0(%arg0: i32, %arg1: i32) -> (i32, i32, i32) {
    %c0_i32 = arith.constant 0 : i32
    %c0_i32_0 = arith.constant 0 : i32
    return %arg0, %c0_i32, %arg1 : i32, i32, i32
  }
  func.func @transform_1(%arg0: i32, %arg1: i32) -> (i32, i32) {
    %c0_i32 = arith.constant 0 : i32
    %c0_i32_0 = arith.constant 0 : i32
    %c0_i32_1 = arith.constant 0 : i32
    return %c0_i32, %c0_i32_0 : i32, i32
  }
  func.func @transform_2(%arg0: i32, %arg1: i32) -> (i32, i32) {
    %c0_i32 = arith.constant 0 : i32
    %c0_i32_0 = arith.constant 0 : i32
    %c0_i32_1 = arith.constant 0 : i32
    return %c0_i32, %c0_i32_0 : i32, i32
  }
  func.func @transform_3(%arg0: i32, %arg1: i32) -> (i32, i32) {
    %c0_i32 = arith.constant 0 : i32
    %c0_i32_0 = arith.constant 0 : i32
    %c0_i32_1 = arith.constant 0 : i32
    return %c0_i32, %c0_i32_0 : i32, i32
  }
  func.func @transform_4(%arg0: i32, %arg1: i32) -> (i32, i32) {
    %c0_i32 = arith.constant 0 : i32
    %c0_i32_0 = arith.constant 0 : i32
    %c0_i32_1 = arith.constant 0 : i32
    return %c0_i32, %c0_i32_0 : i32, i32
  }
  func.func @transform_5(%arg0: i32, %arg1: i32) -> (i32, i32, i32) {
    %c0_i32 = arith.constant 0 : i32
    %c0_i32_0 = arith.constant 0 : i32
    %c0_i32_1 = arith.constant 0 : i32
    return %arg0, %c0_i32, %c0_i32_0 : i32, i32, i32
  }
}

</mosaic_0001>

<bundles_post_ra>
// kernel: tpu_custom_call.1
= control target key start
LH: loop header
LB: loop body
LE: loop exit
PB: predicated region body
PF: predicated region fallthrough
CT: control target
= control target key end

     0   :  { %10 = vsyncpa [#allocation5], 0  ;;  %s959_s0 = inlined_call_operand.hbm [shape: f32[2,4,256], index: 0, kind: input, shape index: {}]   ;;  %s960_s1 = inlined_call_operand.vmem [shape: f32[4,8], index: 1, kind: input, shape index: {}]   ;;  %s961_s2 = inlined_call_operand.vmem [shape: f32[1,8], index: 2, kind: input, shape index: {}]   ;;  %s962_s3 = inlined_call_operand.vmem [shape: f32[8,4], index: 3, kind: input, shape index: {}]   ;;  %s963_s4 = inlined_call_operand.vmem [shape: f32[1,4], index: 4, kind: input, shape index: {}]   ;;  %s964_s5 = inlined_call_operand.hbm [shape: f32[2,1,4], index: 5, kind: output, shape index: {}]  }
   0x1   :  { %12 = vsyncpa [#allocation5 + $0x1], 0 }
   0x2   :  { %13 = vsyncpa [#allocation6], 0 }
   0x3   :  { %15 = vsyncpa [#allocation6 + $0x1], 0  ;;  %s815_s18 = smov 0   ;;  %s817_s19 = smov 0  }
   0x4   :  { %s819_s20 = smov 0   ;;  %s821_s21 = smov 0  }
   0x5   :  { %s823_s22 = smov 0   ;;  %s825_s23 = smov 0  }
   0x6 LB: > { %s573_s24 = sadd.s32 4294967295, %s780_s23   ;;  %s574_s25 = sadd.s32 4294967294, %s780_s23   ;;  %s780_s23 = sphi %s825_s23, %s21_s23   ;;  %s776_s22 = sphi %s823_s22, %s973_s22   ;;  %s772_s21 = sphi %s821_s21, %s972_s21   ;;  %s768_s20 = sphi %s819_s20, %s971_s20   ;;  %s764_s19 = sphi %s817_s19, %s970_s19   ;;  %s760_s18 = sphi %s815_s18, %s969_s18  }
   0x7   : > { %s33_s26 = sadd.s32 1, %s776_s22  ;;  %s42_s27 = sadd.s32 1, %s768_s20 }
   0x8   : > { %p35_p0 = scmp.ge.s32.totalorder %s33_s26, 2  ;;  %p49_p1 = scmp.ne.s32.totalorder %s768_s20, %s764_s19 }
   0x9   : > { %p50_p2 = scmp.eq.s32.totalorder %s780_s23, 0  ;;  %p55_p3 = scmp.ne.s32.totalorder %s764_s19, %s760_s18 }
   0xa   : > { %s975_s26 = smov (%p35_p0, %s33_s26), 0  ;;  %p56_p5 = scmp.eq.s32.totalorder %s573_s24, 0 }
   0xb   : > { %p856_p4 = por %p50_p2, %p49_p1  ;;  %s37_s29 = ssub.s32 %s776_s22, %s975_s26 }
   0xc   : > { %p163_p6 = scmp.eq.s32.totalorder %s573_s24, 1  ;;  %p40_p7 = scmp.eq.s32.totalorder %s37_s29, 0 }
   0xd   : > { %p862_p8 = por %p56_p5, %p55_p3  ;;  %p169_p10 = scmp.eq.s32.totalorder %s574_s25, 1 }
   0xe   : > { %p866_p9 = por %p163_p6, %p49_p1  ;;  %p576_p12 = scmp.ge.s32.totalorder %s780_s23, 2 }
   0xf   : > { %s871_s7 = scalar_select %p40_p7, %s768_s20, %s42_s27  }
  0x10   : > { %p873_p11 = por %p169_p10, %p55_p3  ;;  %p605_p13 = scmp.lt.s32.totalorder %s780_s23, 2 }
  0x11   : > { %s201_s9 = sand.u32 1, %s768_s20   ;;  %s592_s11 = sshll.u32 %s776_s22, 3 }
  0x12   : > { %s577_s10 = sshll.u32 %s201_s9, 3  ;;  %s212_s14 = scalar_lea.hbm %s959_s0, %s592_s11 }
  0x13   : > { %s205_s15 = scalar_lea.vmem [#allocation4], %s577_s10  ;;  %s214_s17 = sshll.u32 %s212_s14, 4  ;;  %s215_s17 = int_to_ptr.hbm [resolvable:$true] %s214_s17 }
  0x14   : > { %s216_s16 = sshll.u32 %s205_s15, 4  ;;  %p598_p0 = pnand %p605_p13, %p856_p4  ;;  %s217_s16 = int_to_ptr.vmem [resolvable:$true] %s216_s16 }
  0x15   : > { %p580_p1 = scmp.ge.s32.totalorder %s780_s23, 1  ;;  %p221_p2 = scmp.lt.s32.totalorder %s780_s23, 3 }
  0x16   : > { %s202_s24 = scalar_lea.sflag [#allocation5], %s201_s9 }
  0x17   : > { %600 = dma.hbm_to_vmem [thread:$0]  (!%p598_p0), %s215_s17, 128, %s217_s16, %s202_s24  }
  0x18   : > { %p222_p3 = pnand %p580_p1, %p221_p2 }
  0x19   : > { %s889_s25 = sand.u32 (!%p222_p3), 1, %s764_s19  }
  0x1a   : > { %225 = sbr.rel (%p222_p3) target bundleno = 743 (0x2e7), region = 40  ;;  %s581_s27 = sshll.u32 (!%p222_p3), %s889_s25, 3 }
  0x1b   : > { %s228_s29 = scalar_lea.sflag (!%p222_p3), [#allocation5], %s889_s25  ;;  %s231_s10 = scalar_lea.vmem (!%p222_p3), [#allocation4], %s581_s27 }
  0x1f   : > { %751 = dma.done.wait (%p862_p8), %s228_s29, 128  }
  0x20   : > { %753 = vsyncadd (%p862_p8), %s228_s29, 4294967168  ;;  %v266_v0 = vld [vmem:[%s231_s10] sm:$0xff]  ;;  %vm274_vm0 = vcmask 1043456   ;;  %v782_v17 = vmov 0   ;;  %vm263_vm1 = vcmask 24576   ;;  %v783_v18 = vmov -inf   ;;  %s492_s24 = scalar_lea.hbm %s964_s5, %s772_s21 }
  0x21   : > { %269 = vst [vmem:[#allocation1] ss:$2 sm:$0xff] %v266_v0  ;;  %658 = vset.pattern.permute.xlu1 %v782_v17  ;;  %659 = vset.pattern.permute.xlu0 %v782_v17  ;;  %v784_v25 = vmov 0.0   ;;  %v337_v26 = vld [vmem:[%s960_s1] sm:$0xf]  ;;  %v296_v27 = vlaneseq  ;;  %vm343_vm2 = vcmask 31744  }
  0x22   : > { %265 = vst.msk [vmem:[#allocation3] sm:$0x1] %vm263_vm1, %v783_v18  ;;  %586 = vmatpush.msk.msra.mxu2 %vm274_vm0, %v337_v26  ;;  %582 = vmatpush.msk.msra.mxu0 %vm274_vm0, %v337_v26  ;;  %v339_v40 = vld [vmem:[%s962_s3] sm:$0xff]  ;;  %vm371_vm3 = vcmask 64512   ;;  %s257_s27 = scalar_lea.vmem [#allocation7], %s889_s25  ;;  %s496_s10 = sshll.u32 %s492_s24, 4  ;;  %s497_s10 = int_to_ptr.hbm [resolvable:$true] %s496_s10 }
  0x23   : > { %264 = vst.msk [vmem:[#allocation2] sm:$0x1] %vm263_vm1, %v784_v25  ;;  %v297_v28 = vand.u32 127, %v296_v27  ;;  %457 = vmatpush.msra.mxu3 %v339_v40  ;;  %390 = vmatpush.msra.mxu1 %v339_v40  ;;  %v338_v41 = vld [vmem:[%s961_s2] sm:$0x1]  ;;  %s494_s29 = sshll.u32 %s257_s27, 4  ;;  %s495_s29 = int_to_ptr.vmem [resolvable:$true] %s494_s29 }
  0x24   : > { %v340_v48 = vld [vmem:[%s963_s4] sm:$0x1]  ;;  %s484_s21 = scalar_lea.sflag [#allocation6], %s889_s25  ;;  %s712_s28 = sshra.s32 %s497_s10, 4  ;;  %s713_s28 = int_to_ptr.hbm [resolvable:$true] %s712_s28 }
  0x25   : > { %s714_s30 = scalar_lea.hbm %s713_s28, 1  ;;  %s718_s12 = scalar_lea.hbm %s964_s5, 2 }
  0x26   : > { %p715_p4 = scmp.ne.s32.totalorder %s713_s28, %s714_s30  ;;  %p719_p7 = scmp.lt.s32.totalorder %s713_s28, %s964_s5 }
  0x27   : > { %p720_p8 = scmp.lt.s32.totalorder %s718_s12, %s714_s30 }
  0x28   : > { %v270_v1 = vld.sshfl [vmem:[#allocation1] sm:$0xff pattern:$0x75316420]  ;;  %v271_v2 = vld.sshfl [vmem:[#allocation1 + $0x8] sm:$0xff pattern:$0x75316420]  ;;  %p716_p5 = pnand %p715_p4, %p866_p9 }
  0x29   : > { %v275_v3 = vsel %vm274_vm0, %v270_v1, 0.0  ;;  %v276_v4 = vsel %vm274_vm0, %v271_v2, 0.0  ;;  %v303_v30 = vld [vmem:[#allocation3] sm:$0x1]  ;;  %p721_p10 = por %p720_p8, %p719_p7 }
  0x2a   : > { %v277_v5 = vadd.f32 %v276_v4, %v275_v3  ;;  %v267_v34 = vld [vmem:[#allocation2] sm:$0x1]  ;;  %p717_p6 = pneg %p716_p5 }
  0x2c   : > { %278 = vadd.xlane.f32.xlu0 %v277_v5  ;;  %p722_p13 = pnand %p721_p10, %p717_p6 }
  0x9f   : > { %v279_v6 = vpop.xlane.xlu0 %278 }
  0xa0   : > { %v281_v7 = vperm.slane %v279_v6, 0  ;;  %v282_v8 = vperm.slane %v279_v6, 1  ;;  %v283_v9 = vperm.slane %v279_v6, 2  ;;  %v284_v10 = vperm.slane %v279_v6, 3 }
  0xa2   : > { %285 = vst [vmem:[#allocation1] ss:$9 sm:$0xff] %v281_v7 }
  0xa3   : > { %287 = vst [vmem:[#allocation1 + $0x1] ss:$9 sm:$0xff] %v282_v8 }
  0xa4   : > { %289 = vst [vmem:[#allocation1 + $0x2] ss:$9 sm:$0xff] %v283_v9 }
  0xa5   : > { %291 = vst [vmem:[#allocation1 + $0x3] ss:$9 sm:$0xff] %v284_v10 }
  0xac   : > { %v292_v11 = vld [vmem:[#allocation1] sm:$0xff] }
  0xad   : > { %304 = vst [vmem:[#allocation1] ss:$2 sm:$0xff] %v266_v0 }
  0xb4   : > { %v305_v12 = vld.sshfl [vmem:[#allocation1] sm:$0xff pattern:$0x75316420]  ;;  %v306_v13 = vld.sshfl [vmem:[#allocation1 + $0x8] sm:$0xff pattern:$0x75316420] }
  0xb5   : > { %v309_v14 = vsel %vm274_vm0, %v305_v12, -inf  ;;  %v310_v15 = vsel %vm274_vm0, %v306_v13, -inf }
  0xb6   : > { %v311_v16 = vmax.f32 %v309_v14, %v310_v15 }
  0xb8   : > { %312 = vmax.xlane.f32.xlu0 %v311_v16 }
 0x12b   : > { %v313_v19 = vpop.xlane.xlu0 %312 }
 0x12c   : > { %v315_v20 = vperm.slane %v313_v19, 0  ;;  %v316_v21 = vperm.slane %v313_v19, 1  ;;  %v317_v22 = vperm.slane %v313_v19, 2  ;;  %v318_v23 = vperm.slane %v313_v19, 3 }
 0x12e   : > { %319 = vst [vmem:[#allocation1] ss:$9 sm:$0xff] %v315_v20 }
 0x12f   : > { %321 = vst [vmem:[#allocation1 + $0x1] ss:$9 sm:$0xff] %v316_v21 }
 0x130   : > { %323 = vst [vmem:[#allocation1 + $0x2] ss:$9 sm:$0xff] %v317_v22 }
 0x131   : > { %325 = vst [vmem:[#allocation1 + $0x3] ss:$9 sm:$0xff] %v318_v23 }
 0x138   : > { %v326_v24 = vld [vmem:[#allocation1] sm:$0xff] }
 0x139   : > { %328 = vperm.xlu1 %658, %v326_v24  }
 0x141   : > { %294 = vperm.xlu1 %658, %v292_v11  }
 0x1ab   : > { %v329_v29 = vpop.permute.xlu1 %328 }
 0x1ac   : > { %v330_v31 = vperm.slane %v329_v29, %v297_v28 }
 0x1ae   : > { %v332_v32 = vmax.f32 %v303_v30, %v330_v31 }
 0x1b0   : > { %333 = vst.msk [vmem:[#allocation3] sm:$0x1] %vm263_vm1, %v332_v32 }
 0x1b3   : > { %v295_v33 = vpop.permute.xlu1 %294 }
 0x1b4   : > { %v298_v35 = vperm.slane %v295_v33, %v297_v28 }
 0x1b6   : > { %v300_v36 = vadd.f32 %v298_v35, %v267_v34 }
 0x1b7   : > { %v414_v37 = vld [vmem:[#allocation3] sm:$0x1] }
 0x1b8   : > { %302 = vst.msk [vmem:[#allocation2] sm:$0x1] %vm263_vm1, %v300_v36  ;;  %587 = vmatmul.msk.f32.vlgmr.msra.gmra.mxu2 %vm343_vm2, %v414_v37 }
 0x1bf   : > { %v341_v38 = vld [vmem:[#allocation2] sm:$0x1] }
 0x1c0   : > { %v342_v39 = vmul.f32 0.00390625, %v341_v38 }
 0x1c2   : > { %583 = vmatmul.msk.f32.vlgmr.msra.gmra.mxu0 %vm343_vm2, %v342_v39 }
 0x23b   : > { %v435_v42 = vpop.f32.mrf.mxu2 }
 0x23c   : > { %v436_v43 = vadd.f32 %v435_v42, %v338_v41 }
 0x23e   : > { %v438_v44 = vmax.f32 %v436_v43, 0.0 }
 0x23f   : > { %v367_v45 = vpop.f32.mrf.mxu0 }
 0x240   : > { %v368_v46 = vadd.f32 %v367_v45, %v338_v41  ;;  %588 = vmatmul.msk.f32.vlgmr.msra.gmra.mxu3 %vm371_vm3, %v438_v44 }
 0x242   : > { %v370_v47 = vmax.f32 %v368_v46, 0.0 }
 0x244   : > { %584 = vmatmul.msk.f32.vlgmr.msra.gmra.mxu1 %vm371_vm3, %v370_v47 }
 0x2c1   : > { %v392_v49 = vpop.f32.mrf.mxu1 }
 0x2c2   : > { %v393_v50 = vadd.f32 %v392_v49, %v340_v48 }
 0x2c3   : > { %v459_v51 = vpop.f32.mrf.mxu3 }
 0x2c4   : > { %v585_v52 = vmul.f32 -1.442695, %v393_v50  ;;  %v460_v53 = vadd.f32 %v459_v51, %v340_v48 }
 0x2c6   : > { %660 = vpow2.f32 %v585_v52  ;;  %v589_v54 = vmul.f32 -1.442695, %v460_v53 }
 0x2c8   : > { %662 = vpow2.f32 %v589_v54 }
 0x2cc   : > { %v661_v55 = vpop.eup %660 }
 0x2cd   : > { %v398_v56 = vadd.f32 1.0, %v661_v55 }
 0x2ce   : > { %v663_v57 = vpop.eup %662 }
 0x2cf   : > { %664 = vrcp.f32 %v398_v56  ;;  %v465_v58 = vadd.f32 1.0, %v663_v57  ;;  %vm404_vm5 = vweird.f32 %v398_v56  ;;  %v410_v3 = vand.u32 2147483648, %v398_v56 }
 0x2d0   : > { %v408_v5 = vand.u32 2147483647, %v398_v56 }
 0x2d1   : > { %666 = vrcp.f32 %v465_v58  ;;  %v477_v4 = vand.u32 2147483648, %v465_v58  ;;  %v475_v7 = vand.u32 2147483647, %v465_v58  ;;  %vm471_vm8 = vweird.f32 %v465_v58 }
 0x2d2   : > { %v411_v10 = vor.u32 1.1754944e-38, %v410_v3  ;;  %vm409_vm10 = vcmp.eq.f32.partialorder %v408_v5, 8.507059e+37 }
 0x2d3   : > { %v478_v11 = vor.u32 1.1754944e-38, %v477_v4  ;;  %vm476_vm11 = vcmp.eq.f32.partialorder %v475_v7, 8.507059e+37 }
 0x2d5   : > { %v665_v59 = vpop.eup %664 }
 0x2d6   : > { %v400_v60 = vmul.f32 %v665_v59, %v398_v56  ;;  %vm405_vm4 = vweird.f32 %v665_v59 }
 0x2d7   : > { %v667_v61 = vpop.eup %666  ;;  %vm406_vm7 = vmor %vm404_vm5, %vm405_vm4 }
 0x2d8   : > { %v401_v62 = vsub.f32 1.0, %v400_v60  ;;  %v467_v63 = vmul.f32 %v667_v61, %v465_v58  ;;  %vm472_vm6 = vweird.f32 %v667_v61 }
 0x2d9   : > { %vm473_vm9 = vmor %vm471_vm8, %vm472_vm6 }
 0x2da   : > { %v402_v0 = vmul.f32 %v665_v59, %v401_v62  ;;  %v468_v1 = vsub.f32 1.0, %v467_v63 }
 0x2dc   : > { %v403_v2 = vadd.f32 %v665_v59, %v402_v0  ;;  %v469_v6 = vmul.f32 %v667_v61, %v468_v1 }
 0x2de   : > { %v470_v8 = vadd.f32 %v667_v61, %v469_v6  ;;  %v407_v9 = vsel %vm406_vm7, %v665_v59, %v403_v2 }
 0x2df   : > { %v412_v13 = vsel %vm409_vm10, %v411_v10, %v407_v9 }
 0x2e0   : > { %v474_v12 = vsel %vm473_vm9, %v667_v61, %v470_v8 }
 0x2e1   : > { %v479_v14 = vsel %vm476_vm11, %v478_v11, %v474_v12 }
 0x2e2   : > { %v481_v15 = vadd.f32 %v479_v14, %v412_v13 }
 0x2e4   : > { %482 = vst.msk [vmem:[%s257_s27] sm:$0x1] %vm263_vm1, %v481_v15 }
 0x2e5   : > { %725 = shalt.err (!%p722_p13)
}
 0x2e6   : > { %595 = dma.vmem_to_hbm [thread:$0]  (%p866_p9), %s495_s29, 16, %s497_s10, %s484_s21  }
 0x2e7 PF: > { %s508_s25 = sand.u32 1, %s760_s18   ;;  %p602_p0 = pnand %p576_p12, %p873_p11 }
 0x2e8   : > { %s509_s15 = scalar_lea.sflag [#allocation6], %s508_s25 }
 0x2e9   : > { %p603_p1 = pneg %p602_p0 }
 0x2eb   : > { %755 = dma.done.wait (%p603_p1), %s509_s15, 16  }
 0x2ec   : > { %757 = vsyncadd (%p603_p1), %s509_s15, 4294967280  ;;  %s21_s23 = sadd.s32 1, %s780_s23   ;;  %s969_s18 = smov %s764_s19 }
 0x2ed   : > { %p18_p2 = scmp.ge.s32.totalorder %s21_s23, 4   ;;  %s970_s19 = smov %s768_s20 }
 0x2ee   : > { %s971_s20 = smov %s871_s7  ;;  %s972_s21 = smov %s776_s22 }
 0x2ef   : > { %s973_s22 = smov %s975_s26  ;;  %20 = sbr.rel (!%p18_p2) target bundleno = 6 (0x6), region = 99 }
 0x2f4   :  { %514 = vsyncpa [#allocation5], 1 }
 0x2f5   :  { %516 = vsyncpa [#allocation5 + $0x1], 1 }
 0x2f6   :  { %517 = vsyncpa [#allocation6], 1 }
 0x2f7   :  { %519 = vsyncpa [#allocation6 + $0x1], 1 }

</bundles_post_ra>
